<compile_context>
chip_gen: v7x
topology: tpu7x:2x2x1
jax: 0.10.0
libtpu: 0.0.40
codegen_flags: <defaults>
</compile_context>

<pallas_src>
import functools

import jax
import jax.numpy as jnp
from jax.experimental import pallas as pl
from jax.experimental.pallas import tpu as pltpu

LANE = 128


def _round_up(x: int, m: int) -> int:
    return ((x + m - 1) // m) * m


def _actor_kernel(state_ref, w1_ref, b1_ref, w2_ref, b2_ref, w3_ref, b3_ref,
                  out_ref):
    # Normalization is folded into (W1, b1); feed state straight to the MXU.
    x = state_ref[...].astype(jnp.bfloat16)                       # (TB, state_dim)

    h = jnp.dot(x, w1_ref[...],
                preferred_element_type=jnp.float32) + b1_ref[...]  # (TB, h1p) f32
    h = jnp.maximum(h, 0.0)

    h = jnp.dot(h.astype(jnp.bfloat16), w2_ref[...],
                preferred_element_type=jnp.float32) + b2_ref[...]  # (TB, h2p) f32
    h = jnp.maximum(h, 0.0)

    y = jnp.dot(h.astype(jnp.bfloat16), w3_ref[...],
                preferred_element_type=jnp.float32) + b3_ref[...]  # (TB, action_dim)
    out_ref[...] = jnp.tanh(y)


def _choose_tb(B: int) -> int:
    """Batch tile: multiple of 8 (f32 sublanes), >=2 blocks for non-trivial B
    (v7x megacore), capped so per-block activations stay small in VMEM."""
    if B <= 16:
        return _round_up(B, 8)
    return min(2048, _round_up((B + 1) // 2, 8))


@jax.jit
def actor_forward(state, w1p, b1p, w2p, b2p, w3p, b3p):
    """state: (B, state_dim) f32; params from prepare_params (bf16 weights,
    f32 biases, hidden dims padded to 128 lanes, norm folded into layer 1)."""
    B, state_dim = state.shape
    h1p = w1p.shape[1]
    h2p = w2p.shape[1]
    action_dim = w3p.shape[1]

    tb = _choose_tb(B)
    grid = (pl.cdiv(B, tb),)

    out = pl.pallas_call(
        _actor_kernel,
        out_shape=jax.ShapeDtypeStruct((B, action_dim), jnp.float32),
        grid=grid,
        in_specs=[
            pl.BlockSpec((tb, state_dim), lambda i: (i, 0)),   # state tile (true width)
            pl.BlockSpec((state_dim, h1p), lambda i: (0, 0)),  # W1' bf16 (resident)
            pl.BlockSpec((1, h1p), lambda i: (0, 0)),          # b1' f32
            pl.BlockSpec((h1p, h2p), lambda i: (0, 0)),        # W2  bf16
            pl.BlockSpec((1, h2p), lambda i: (0, 0)),          # b2  f32
            pl.BlockSpec((h2p, action_dim), lambda i: (0, 0)),  # W3 bf16 (true out width)
            pl.BlockSpec((1, action_dim), lambda i: (0, 0)),   # b3  f32
        ],
        out_specs=pl.BlockSpec((tb, action_dim), lambda i: (i, 0)),
        compiler_params=pltpu.CompilerParams(
            dimension_semantics=("parallel",),                 # megacore on v7x
        ),
    )(state, w1p, b1p, w2p, b2p, w3p, b3p)

    return out


def prepare_params(state_avg, state_std, w1, b1, w2, b2, w3, b3):
    """Fold normalization into layer 1, pad hidden dims to 128 lanes, keep
    state_dim / action_dim at true widths, cast weights to bf16."""
    w1 = jnp.asarray(w1, jnp.float32)
    b1 = jnp.asarray(b1, jnp.float32)
    w2 = jnp.asarray(w2, jnp.float32)
    b2 = jnp.asarray(b2, jnp.float32)
    w3 = jnp.asarray(w3, jnp.float32)
    b3 = jnp.asarray(b3, jnp.float32)

    state_dim, h1 = w1.shape
    h2 = w2.shape[1]
    action_dim = w3.shape[1]

    h1p = _round_up(h1, LANE)
    h2p = _round_up(h2, LANE)

    # Clamp std so a near-zero running std (common early in training) does not
    # produce inf/NaN.
    std = jnp.maximum(jnp.asarray(state_std, jnp.float32), 1e-4)
    inv_std = 1.0 / std
    shift = -jnp.asarray(state_avg, jnp.float32) * inv_std

    # (x*inv_std + shift) @ W1 + b1  ==  x @ (inv_std[:,None]*W1) + (shift@W1 + b1)
    w1f = inv_std[:, None] * w1
    b1f = shift @ w1 + b1

    def pad2(a, r, c, dtype):
        out = jnp.zeros((r, c), dtype)
        return out.at[:a.shape[0], :a.shape[1]].set(a.astype(dtype))

    return (
        pad2(w1f, state_dim, h1p, jnp.bfloat16),
        pad2(b1f.reshape(1, -1), 1, h1p, jnp.float32),
        pad2(w2, h1p, h2p, jnp.bfloat16),
        pad2(b2.reshape(1, -1), 1, h2p, jnp.float32),
        pad2(w3, h2p, action_dim, jnp.bfloat16),
        pad2(b3.reshape(1, -1), 1, action_dim, jnp.float32),
    )


def _orthogonal(key, shape, gain=1.0):
    # Deterministic orthogonal init (mimics torch.nn.init.orthogonal_).
    rows, cols = shape
    a = jax.random.normal(key, (max(rows, cols), min(rows, cols)), jnp.float32)
    q, r = jnp.linalg.qr(a)
    q = q * jnp.sign(jnp.diagonal(r))
    if rows < cols:
        q = q.T
    return gain * q[:rows, :cols]


def make_params(key, state_dim, dims, action_dim):
    """Deterministic synthetic parameters matching Actor.__init__ shapes
    (weights stored as (in_features, out_features))."""
    k1, k2, k3 = jax.random.split(key, 3)
    h1, h2 = dims

    w1 = jax.random.normal(k1, (state_dim, h1), jnp.float32) * 0.1
    b1 = jnp.zeros((h1,), jnp.float32)
    w2 = jax.random.normal(k2, (h1, h2), jnp.float32) * 0.1
    b2 = jnp.zeros((h2,), jnp.float32)

    # Output layer: orthogonal init std=0.1, bias=1e-6 (layer_init_with_orthogonal).
    w3 = _orthogonal(k3, (h2, action_dim), gain=0.1)
    b3 = jnp.full((action_dim,), 1e-6, jnp.float32)

    # ActorBase buffers.
    state_avg = jnp.zeros((state_dim,), jnp.float32)
    state_std = jnp.ones((state_dim,), jnp.float32)

    return state_avg, state_std, w1, b1, w2, b2, w3, b3


def reference_forward(state, state_avg, state_std, w1, b1, w2, b2, w3, b3):
    x = (state - state_avg) / state_std
    h = jnp.maximum(x @ w1 + b1, 0.0)
    h = jnp.maximum(h @ w2 + b2, 0.0)
    return jnp.tanh(h @ w3 + b3)


if __name__ == "__main__":
    key = jax.random.PRNGKey(0)
    k_state, k_state2, k_params = jax.random.split(key, 3)

    state_dim = 16
    dims = (32, 32)
    action_dim = 8

    params = make_params(k_params, state_dim, dims, action_dim)
    packed = prepare_params(*params)

    # bf16 MXU inputs with f32 accumulation -> loosen tolerance vs f32 reference.
    TOL = dict(atol=2e-2, rtol=2e-2)

    # Small batch (matches the module's toy usage); single partial block.
    B = 2
    state = jax.random.normal(k_state, (B, state_dim), jnp.float32)
    out = jax.block_until_ready(actor_forward(state, *packed))
    ref = reference_forward(state, *params)
    assert out.shape == (B, action_dim)
    assert jnp.allclose(out, ref, **TOL), float(jnp.max(jnp.abs(out - ref)))

    # Larger batch: 2 grid blocks with an uneven final block (600 = 304 + 296).
    B2 = 600
    state2 = jax.random.normal(k_state2, (B2, state_dim), jnp.float32)
    out2 = jax.block_until_ready(actor_forward(state2, *packed))
    ref2 = reference_forward(state2, *params)
    assert out2.shape == (B2, action_dim)
    assert jnp.allclose(out2, ref2, **TOL), float(jnp.max(jnp.abs(out2 - ref2)))

    print("KERNEL_OK")
</pallas_src>

<mosaic_0001>
module attributes {stable_mosaic.version = 11 : i64} {
  func.func @_actor_kernel(%arg0: i32, %arg1: memref<8x16xf32, #tpu.memory_space<vmem>>, %arg2: memref<16x128xbf16, #tpu.memory_space<vmem>>, %arg3: memref<1x128xf32, #tpu.memory_space<vmem>>, %arg4: memref<128x128xbf16, #tpu.memory_space<vmem>>, %arg5: memref<1x128xf32, #tpu.memory_space<vmem>>, %arg6: memref<128x8xbf16, #tpu.memory_space<vmem>>, %arg7: memref<1x8xf32, #tpu.memory_space<vmem>>, %arg8: memref<8x8xf32, #tpu.memory_space<vmem>>) attributes {dimension_semantics = [#tpu.dimension_semantics<parallel>], iteration_bounds = array<i64: 1>, scalar_prefetch = 0 : i64, scratch_operands = 0 : i64, tpu.core_type = #tpu.core_type<tc>, window_params = [{transform_indices = @transform_0, window_bounds = array<i64: 8, 16>}, {pipeline_mode = #tpu.pipeline_mode<synchronous>, transform_indices = @transform_1, window_bounds = array<i64: 16, 128>}, {pipeline_mode = #tpu.pipeline_mode<synchronous>, transform_indices = @transform_2, window_bounds = array<i64: 1, 128>}, {pipeline_mode = #tpu.pipeline_mode<synchronous>, transform_indices = @transform_3, window_bounds = array<i64: 128, 128>}, {pipeline_mode = #tpu.pipeline_mode<synchronous>, transform_indices = @transform_4, window_bounds = array<i64: 1, 128>}, {pipeline_mode = #tpu.pipeline_mode<synchronous>, transform_indices = @transform_5, window_bounds = array<i64: 128, 8>}, {pipeline_mode = #tpu.pipeline_mode<synchronous>, transform_indices = @transform_6, window_bounds = array<i64: 1, 8>}, {transform_indices = @transform_7, window_bounds = array<i64: 8, 8>}]} {
    %c0 = arith.constant 0 : index
    %c0_0 = arith.constant 0 : index
    %0 = vector.load %arg1[%c0, %c0_0] : memref<8x16xf32, #tpu.memory_space<vmem>>, vector<8x16xf32>
    %1 = arith.truncf %0 : vector<8x16xf32> to vector<8x16xbf16>
    %c0_1 = arith.constant 0 : index
    %c0_2 = arith.constant 0 : index
    %2 = vector.load %arg2[%c0_1, %c0_2] : memref<16x128xbf16, #tpu.memory_space<vmem>>, vector<16x128xbf16>
    %cst = arith.constant dense<0.000000e+00> : vector<8x128xf32>
    %3 = tpu.matmul %1, %2, %cst {dimension_numbers = #tpu.dot_dimension_numbers<[1], [0], [0], [1], [0, 0, 1, 1], [], []>} : vector<8x16xbf16>, vector<16x128xbf16>, vector<8x128xf32> -> vector<8x128xf32>
    %c0_3 = arith.constant 0 : index
    %c0_4 = arith.constant 0 : index
    %4 = vector.load %arg3[%c0_3, %c0_4] : memref<1x128xf32, #tpu.memory_space<vmem>>, vector<1x128xf32>
    %5 = vector.broadcast %4 : vector<1x128xf32> to vector<8x128xf32>
    %6 = arith.addf %3, %5 : vector<8x128xf32>
    %cst_5 = arith.constant 0.000000e+00 : f32
    %7 = vector.broadcast %cst_5 : f32 to vector<8x128xf32>
    %8 = arith.maximumf %6, %7 : vector<8x128xf32>
    %9 = arith.truncf %8 : vector<8x128xf32> to vector<8x128xbf16>
    %c0_6 = arith.constant 0 : index
    %c0_7 = arith.constant 0 : index
    %10 = vector.load %arg4[%c0_6, %c0_7] : memref<128x128xbf16, #tpu.memory_space<vmem>>, vector<128x128xbf16>
    %cst_8 = arith.constant dense<0.000000e+00> : vector<8x128xf32>
    %11 = tpu.matmul %9, %10, %cst_8 {dimension_numbers = #tpu.dot_dimension_numbers<[1], [0], [0], [1], [0, 0, 1, 1], [], []>} : vector<8x128xbf16>, vector<128x128xbf16>, vector<8x128xf32> -> vector<8x128xf32>
    %c0_9 = arith.constant 0 : index
    %c0_10 = arith.constant 0 : index
    %12 = vector.load %arg5[%c0_9, %c0_10] : memref<1x128xf32, #tpu.memory_space<vmem>>, vector<1x128xf32>
    %13 = vector.broadcast %12 : vector<1x128xf32> to vector<8x128xf32>
    %14 = arith.addf %11, %13 : vector<8x128xf32>
    %cst_11 = arith.constant 0.000000e+00 : f32
    %15 = vector.broadcast %cst_11 : f32 to vector<8x128xf32>
    %16 = arith.maximumf %14, %15 : vector<8x128xf32>
    %17 = arith.truncf %16 : vector<8x128xf32> to vector<8x128xbf16>
    %c0_12 = arith.constant 0 : index
    %c0_13 = arith.constant 0 : index
    %18 = vector.load %arg6[%c0_12, %c0_13] : memref<128x8xbf16, #tpu.memory_space<vmem>>, vector<128x8xbf16>
    %cst_14 = arith.constant dense<0.000000e+00> : vector<8x8xf32>
    %19 = tpu.matmul %17, %18, %cst_14 {dimension_numbers = #tpu.dot_dimension_numbers<[1], [0], [0], [1], [0, 0, 1, 1], [], []>} : vector<8x128xbf16>, vector<128x8xbf16>, vector<8x8xf32> -> vector<8x8xf32>
    %c0_15 = arith.constant 0 : index
    %c0_16 = arith.constant 0 : index
    %20 = vector.load %arg7[%c0_15, %c0_16] : memref<1x8xf32, #tpu.memory_space<vmem>>, vector<1x8xf32>
    %21 = vector.broadcast %20 : vector<1x8xf32> to vector<8x8xf32>
    %22 = arith.addf %19, %21 : vector<8x8xf32>
    %23 = math.tanh %22 : vector<8x8xf32>
    %c0_17 = arith.constant 0 : index
    %c0_18 = arith.constant 0 : index
    %24 = vector.load %arg8[%c0_17, %c0_18] : memref<8x8xf32, #tpu.memory_space<vmem>>, vector<8x8xf32>
    tpu.vector_store %arg8[%c0_17, %c0_18], %23 {strides = array<i32>} : memref<8x8xf32, #tpu.memory_space<vmem>>, vector<8x8xf32>,
    return
  }
  func.func @transform_0(%arg0: i32) -> (i32, i32) {
    %c0_i32 = arith.constant 0 : i32
    %c0_i32_0 = arith.constant 0 : i32
    return %arg0, %c0_i32 : i32, i32
  }
  func.func @transform_1(%arg0: i32) -> (i32, i32) {
    %c0_i32 = arith.constant 0 : i32
    %c0_i32_0 = arith.constant 0 : i32
    %c0_i32_1 = arith.constant 0 : i32
    return %c0_i32, %c0_i32_0 : i32, i32
  }
  func.func @transform_2(%arg0: i32) -> (i32, i32) {
    %c0_i32 = arith.constant 0 : i32
    %c0_i32_0 = arith.constant 0 : i32
    %c0_i32_1 = arith.constant 0 : i32
    return %c0_i32, %c0_i32_0 : i32, i32
  }
  func.func @transform_3(%arg0: i32) -> (i32, i32) {
    %c0_i32 = arith.constant 0 : i32
    %c0_i32_0 = arith.constant 0 : i32
    %c0_i32_1 = arith.constant 0 : i32
    return %c0_i32, %c0_i32_0 : i32, i32
  }
  func.func @transform_4(%arg0: i32) -> (i32, i32) {
    %c0_i32 = arith.constant 0 : i32
    %c0_i32_0 = arith.constant 0 : i32
    %c0_i32_1 = arith.constant 0 : i32
    return %c0_i32, %c0_i32_0 : i32, i32
  }
  func.func @transform_5(%arg0: i32) -> (i32, i32) {
    %c0_i32 = arith.constant 0 : i32
    %c0_i32_0 = arith.constant 0 : i32
    %c0_i32_1 = arith.constant 0 : i32
    return %c0_i32, %c0_i32_0 : i32, i32
  }
  func.func @transform_6(%arg0: i32) -> (i32, i32) {
    %c0_i32 = arith.constant 0 : i32
    %c0_i32_0 = arith.constant 0 : i32
    %c0_i32_1 = arith.constant 0 : i32
    return %c0_i32, %c0_i32_0 : i32, i32
  }
  func.func @transform_7(%arg0: i32) -> (i32, i32) {
    %c0_i32 = arith.constant 0 : i32
    %c0_i32_0 = arith.constant 0 : i32
    return %arg0, %c0_i32 : i32, i32
  }
}

</mosaic_0001>

<bundles_post_ra>
// kernel: actor_forward.1
= control target key start
LH: loop header
LB: loop body
LE: loop exit
PB: predicated region body
PF: predicated region fallthrough
CT: control target
= control target key end

     0   :  { %12 = vsyncpa [#allocation3], 0  ;;  %v469_v1 = vmov 0.0   ;;  %vm45_vm0 = vcmask 130048   ;;  %vm470_vm1 = vmmov 0   ;;  %vm316_vm2 = vcmask 64512   ;;  %s609_s0 = inlined_call_operand.vmem [shape: f32[2,16], index: 0, kind: input, shape index: {}]   ;;  %s610_s1 = inlined_call_operand.vmem [shape: bf16[16,128], index: 1, kind: input, shape index: {}]   ;;  %s611_s2 = inlined_call_operand.vmem [shape: f32[1,128], index: 2, kind: input, shape index: {}]   ;;  %s612_s3 = inlined_call_operand.vmem [shape: bf16[128,128], index: 3, kind: input, shape index: {}]   ;;  %s613_s4 = inlined_call_operand.vmem [shape: f32[1,128], index: 4, kind: input, shape index: {}]   ;;  %s614_s5 = inlined_call_operand.vmem [shape: bf16[128,8], index: 5, kind: input, shape index: {}]   ;;  %s615_s6 = inlined_call_operand.vmem [shape: f32[1,8], index: 6, kind: input, shape index: {}]   ;;  %s616_s7 = inlined_call_operand.hbm [shape: f32[2,8], index: 7, kind: output, shape index: {}]  }
   0x1   :  { %v426_v0 = vld [vmem:[%s610_s1] sm:$0xff]   ;;  %375 = vmatprep.subr.bf16.mxu0 %v469_v1  ;;  %381 = vmatprep.subr.bf16.mxu1 %v469_v1  ;;  %v428_v5 = vld [vmem:[%s612_s3 + $0x8] sm:$0xff]   ;;  %v429_v6 = vld [vmem:[%s612_s3 + $0x10] sm:$0xff]  }
   0x2   :  { %v28_v2 = vld [vmem:[%s609_s0] sm:$0xff]  ;;  %376 = vmatpush3.bf16.msra.mxu0 %v426_v0  ;;  %377 = vmatprep.mubr.msk.bf16.mxu0 %vm470_vm1, %v469_v1  ;;  %v430_v7 = vld [vmem:[%s612_s3 + $0x18] sm:$0xff]   ;;  %v432_v9 = vld [vmem:[%s612_s3 + $0x28] sm:$0xff]  }
   0x3   :  { %v427_v3 = vld [vmem:[%s612_s3] sm:$0xff]   ;;  %v29_v4 = vpack.c.bf16 %v28_v2, %v28_v2  ;;  %397 = vmatprep.mubr.msk.bf16.mxu1 %vm470_vm1, %v469_v1  ;;  %401 = vmatprep.subr.bf16.mxu0 %v469_v1  ;;  %v433_v10 = vld [vmem:[%s612_s3 + $0x30] sm:$0xff]   ;;  %v434_v11 = vld [vmem:[%s612_s3 + $0x38] sm:$0xff]  }
   0x4   :  { %382 = vmatpush3.bf16.msra.mxu1 %v427_v3  ;;  %v431_v8 = vld [vmem:[%s612_s3 + $0x20] sm:$0xff]   ;;  %v436_v13 = vld [vmem:[%s614_s5 + $0x8] sm:$0xff]   ;;  %v437_v14 = vld [vmem:[%s614_s5 + $0x10] sm:$0xff]  }
   0x5   :  { %383 = vmatprep.subr.bf16.mxu1 %v469_v1  ;;  %378 = vmatmul.mubr.msk.bf16.vlgmr.msra.gmra.mrb[0].mxu0 %vm45_vm0, %v29_v4  ;;  %v435_v12 = vld [vmem:[%s614_s5] sm:$0xff]   ;;  %v438_v15 = vld [vmem:[%s614_s5 + $0x18] sm:$0xff]   ;;  %v440_v17 = vld [vmem:[%s614_s5 + $0x28] sm:$0xff]  }
   0x6   :  { %417 = vmatprep.mubr.msk.bf16.mxu0 %vm470_vm1, %v469_v1  ;;  %402 = vmatpush3.bf16.msra.mxu0 %v435_v12  ;;  %v439_v16 = vld [vmem:[%s614_s5 + $0x20] sm:$0xff]   ;;  %v441_v26 = vld [vmem:[%s614_s5 + $0x30] sm:$0xff]   ;;  %v442_v27 = vld [vmem:[%s614_s5 + $0x38] sm:$0xff]  }
   0x7   :  { %403 = vmatprep.subr.bf16.mxu0 %v469_v1  ;;  %v334_v18 = vld [vmem:[%s611_s2] ss:$0 sm:$0xff] }
   0x8   :  { %384 = vmatpush3.bf16.msra.mxu1 %v428_v5  ;;  %v337_v28 = vld [vmem:[%s613_s4] ss:$0 sm:$0xff] }
   0x9   :  { %385 = vmatprep.subr.bf16.mxu1 %v469_v1  ;;  %v346_v36 = vld [vmem:[%s615_s6] ss:$0 sm:$0xff] }
   0xa   :  { %404 = vmatpush3.bf16.msra.mxu0 %v436_v13 }
   0xb   :  { %405 = vmatprep.subr.bf16.mxu0 %v469_v1 }
   0xc   :  { %386 = vmatpush3.bf16.msra.mxu1 %v429_v6 }
   0xd   :  { %387 = vmatprep.subr.bf16.mxu1 %v469_v1 }
   0xe   :  { %406 = vmatpush3.bf16.msra.mxu0 %v437_v14 }
   0xf   :  { %407 = vmatprep.subr.bf16.mxu0 %v469_v1 }
  0x10   :  { %388 = vmatpush3.bf16.msra.mxu1 %v430_v7 }
  0x11   :  { %389 = vmatprep.subr.bf16.mxu1 %v469_v1 }
  0x12   :  { %408 = vmatpush3.bf16.msra.mxu0 %v438_v15 }
  0x13   :  { %409 = vmatprep.subr.bf16.mxu0 %v469_v1 }
  0x14   :  { %390 = vmatpush3.bf16.msra.mxu1 %v431_v8 }
  0x15   :  { %391 = vmatprep.subr.bf16.mxu1 %v469_v1 }
  0x16   :  { %410 = vmatpush3.bf16.msra.mxu0 %v439_v16 }
  0x17   :  { %411 = vmatprep.subr.bf16.mxu0 %v469_v1 }
  0x18   :  { %392 = vmatpush3.bf16.msra.mxu1 %v432_v9 }
  0x19   :  { %393 = vmatprep.subr.bf16.mxu1 %v469_v1 }
  0x1a   :  { %412 = vmatpush3.bf16.msra.mxu0 %v440_v17 }
  0x1b   :  { %413 = vmatprep.subr.bf16.mxu0 %v469_v1 }
  0x1c   :  { %394 = vmatpush3.bf16.msra.mxu1 %v433_v10 }
  0x1d   :  { %395 = vmatprep.subr.bf16.mxu1 %v469_v1 }
  0x1e   :  { %414 = vmatpush3.bf16.msra.mxu0 %v441_v26 }
  0x1f   :  { %415 = vmatprep.subr.bf16.mxu0 %v469_v1 }
  0x20   :  { %396 = vmatpush3.bf16.msra.mxu1 %v434_v11 }
  0x22   :  { %416 = vmatpush3.bf16.msra.mxu0 %v442_v27 }
  0xd8   :  { %v83_v19 = vpop.f32.mrb[0].mxu0 }
  0xd9   :  { %v84_v20 = vadd.f32 %v334_v18, %v83_v19  ;;  %v379_v21 = vpop.f32.mrb[1].mxu0 }
  0xda   :  { %v86_v22 = vpop.f32.mrb[2].mxu0 }
  0xdb   :  { %v89_v23 = vmax.f32 %v84_v20, 0.0  ;;  %v380_v24 = vpop.f32.mrb[3].mxu0 }
  0xdd   :  { %v90_v25 = vpack.c.bf16 %v89_v23, %v89_v23 }
  0xdf   :  { %398 = vmatmul.mubr.bf16.vlgmr.msra.gmra.mrb[0].mxu1 %v90_v25 }
 0x1b2   :  { %v196_v29 = vpop.f32.mrb[0].mxu1 }
 0x1b3   :  { %v197_v30 = vadd.f32 %v337_v28, %v196_v29  ;;  %v399_v31 = vpop.f32.mrb[1].mxu1 }
 0x1b4   :  { %v199_v32 = vpop.f32.mrb[2].mxu1 }
 0x1b5   :  { %v202_v33 = vmax.f32 %v197_v30, 0.0  ;;  %v400_v34 = vpop.f32.mrb[3].mxu1 }
 0x1b7   :  { %v203_v35 = vpack.c.bf16 %v202_v33, %v202_v33 }
 0x1b9   :  { %418 = vmatmul.mubr.bf16.vlgmr.msra.gmra.mrb[4].mxu0 %v203_v35 }
 0x28c   :  { %v309_v37 = vpop.f32.mrb[4].mxu0 }
 0x28d   :  { %v310_v38 = vadd.f32 %v346_v36, %v309_v37  ;;  %v419_v39 = vpop.f32.mrb[5].mxu0 }
 0x28e   :  { %v312_v40 = vpop.f32.mrb[6].mxu0 }
 0x28f   :  { %443 = vtanh.f32 %v310_v38  ;;  %v420_v41 = vpop.f32.mrb[7].mxu0 }
 0x299   :  { %v444_v42 = vpop.eup %443 }
 0x29a   :  { %317 = vst.msk [vmem:[#allocation2] sm:$0xff] %vm316_vm2, %v444_v42 }
 0x29b   :  { %322 = vsyncadd [#allocation3], 96  ;;  %s471_s4 = smov [#allocation2]  }
 0x29c   :  { %s323_s5 = sshll.u32 %s471_s4, 4  ;;  %s324_s5 = int_to_ptr.vmem [resolvable:$true] %s323_s5 }
 0x29d   :  { %s445_s14 = scalar_lea.vmem %s324_s5, 32  ;;  %s449_s15 = scalar_lea.vmem %s324_s5, 128 }
 0x29e   :  { %p446_p0 = scmp.ne.s32.totalorder %s324_s5, %s445_s14  ;;  %p450_p1 = scmp.lt.s32.totalorder %s324_s5, %s324_s5 }
 0x29f   :  { %p451_p2 = scmp.lt.s32.totalorder %s449_s15, %s445_s14 }
 0x2a1   :  { %p452_p3 = por %p451_p2, %p450_p1 }
 0x2a3   :  { %p453_p4 = pnand %p452_p3, %p446_p0 }
 0x2a5   :  { %456 = shalt.err (!%p453_p4)
}
 0x2a6   :  { %s457_s17 = scalar_lea.hbm %s616_s7, 32 }
 0x2a7   :  { %p458_p5 = scmp.ne.s32.totalorder %s616_s7, %s457_s17  ;;  %p461_p6 = scmp.lt.u32.totalorder %s457_s17, %s616_s7 }
 0x2a9   :  { %p463_p7 = pnand %p461_p6, %p458_p5 }
 0x2ab   :  { %466 = shalt.err (!%p463_p7)
}
 0x2ac   :  { %s472_s22 = smov 32   ;;  %s473_s23 = smov 2  }
 0x2ad   :  { %329 = dma.vmem_to_hbm [thread:$0]  %s324_s5, 32, %s616_s7, [#allocation3], %s472_s22, %s472_s22, %s473_s23  }
 0x2ae   :  { %467 = dma.done.wait [#allocation3], 128  }
 0x2af   :  { %468 = vsyncadd [#allocation3], 4294967168 }
 0x2b0   :  { %333 = vsyncpa [#allocation3], 1 }

</bundles_post_ra>
